<compile_context>
chip_gen: v6e
topology: v6e:2x2x1
jax: 0.10.0
libtpu: 0.0.40
codegen_flags: <defaults>
</compile_context>

<pallas_src>
from functools import partial

import jax
import jax.numpy as jnp
from jax.experimental import pallas as pl
from jax.experimental.pallas import tpu as pltpu

EPS = 1e-5
CP = 128          # channel lane-group width (hidden sizes padded up to this)
XL = 128          # lane pad for the per-graph loading columns (>= batch)
VEC_ROWS = 8      # sublane-aligned header rows in the parameter slab


def _round_up(x, m):
    return -(-x // m) * m


def _gcn_kernel(a_ref, xt_ref, p_ref, o_ref, *, n, batch, b_pad):
    """Fused GCN_loading forward (one adjacency shared by the whole batch).

    a_ref : (NP, NP)          zero-padded normalized adjacency
    xt_ref: (NP, XL)          node loadings; graph b in lane b, other lanes 0
    p_ref : (VEC_ROWS+CP, CP) rows 0..4 = w1, g1, be1, g2, be2; rows 8.. = W2
    o_ref : (b_pad, CP)       lane-dense per-graph readout (row b = graph b)
    """
    a = a_ref[...]
    w1 = p_ref[0:1, :]
    g1 = p_ref[1:2, :]
    be1 = p_ref[2:3, :]
    g2 = p_ref[3:4, :]
    be2 = p_ref[4:5, :]
    w2 = p_ref[VEC_ROWS:, :]

    inv_cnt = 1.0 / (n * batch)

    # ---- gc1, rank-1: y = A @ X^T ;  gc1(A,X)[b,i,c] = y[i,b] * w1[c] -------
    # (gc1 / gc2 biases are dropped: constant-per-channel offsets are
    #  cancelled exactly by the train-mode BN mean subtraction.)
    y = jnp.dot(a, xt_ref[...], preferred_element_type=jnp.float32)  # (NP, XL)

    # BN1 statistics collapse to two scalars because gc1's output is
    # c-independent in y; padded rows/lanes of y are exactly zero and the
    # element count uses only the n*batch real entries.
    yr = y[0:n, :]
    ybar = jnp.sum(yr) * inv_cnt
    vary = jnp.maximum(jnp.sum(yr * yr) * inv_cnt - ybar * ybar, 0.0)
    ws1 = w1 * (g1 * jax.lax.rsqrt(w1 * w1 * vary + EPS))   # fused w1 * scale1
    sh1 = be1 - ybar * ws1                                  # shift1

    # ---- layer-1 BN+ReLU and gc2 weight matmul, one lane group per graph ----
    parts = []
    for b in range(batch):
        h1b = jnp.maximum(y[:, b:b + 1] * ws1 + sh1, 0.0)             # (NP, CP)
        parts.append(jnp.dot(h1b, w2, preferred_element_type=jnp.float32))
    hw = jnp.concatenate(parts, axis=1) if batch > 1 else parts[0]    # (NP,B*CP)

    # ---- gc2 graph conv: ONE shared-A matmul covering every graph -----------
    h2 = jnp.dot(a, hw, preferred_element_type=jnp.float32)          # (NP,B*CP)

    # ---- BN2 statistics per channel, accumulated across lane groups ---------
    ssum = jnp.zeros((1, CP), jnp.float32)
    ssq = jnp.zeros((1, CP), jnp.float32)
    for b in range(batch):
        blk = h2[0:n, b * CP:(b + 1) * CP]
        ssum = ssum + jnp.sum(blk, axis=0, keepdims=True)
        ssq = ssq + jnp.sum(blk * blk, axis=0, keepdims=True)
    mu2 = ssum * inv_cnt
    var2 = jnp.maximum(ssq * inv_cnt - mu2 * mu2, 0.0)
    s2 = g2 * jax.lax.rsqrt(var2 + EPS)
    sh2 = be2 - mu2 * s2

    # ---- BN2 + ReLU + per-graph node mean, one lane-dense full store --------
    inv_n = 1.0 / n
    rows = []
    for b in range(batch):
        h2b = jnp.maximum(h2[0:n, b * CP:(b + 1) * CP] * s2 + sh2, 0.0)
        rows.append(jnp.sum(h2b, axis=0, keepdims=True) * inv_n)      # (1, CP)
    if b_pad > batch:
        rows.append(jnp.zeros((b_pad - batch, CP), jnp.float32))
    o_ref[...] = jnp.concatenate(rows, axis=0).astype(o_ref.dtype)


def prepare_gcn(A, params):
    """One-time packing of everything that is static across forward calls."""
    n = A.shape[0]
    npad = _round_up(n, 8)
    a_pad = jnp.zeros((npad, npad), jnp.float32).at[:n, :n].set(
        A.astype(jnp.float32))

    h0, h1 = params["w2"].shape
    assert h0 <= CP and h1 <= CP

    def row(v):
        return jnp.zeros((1, CP), jnp.float32).at[0, :v.shape[0]].set(v)

    pslab = jnp.concatenate(
        [row(params["w1"].reshape(-1)), row(params["g1"]), row(params["be1"]),
         row(params["g2"]), row(params["be2"]),
         jnp.zeros((VEC_ROWS - 5, CP), jnp.float32),
         jnp.zeros((CP, CP), jnp.float32).at[:h0, :h1].set(params["w2"])],
        axis=0)
    return a_pad, pslab


@partial(jax.jit, static_argnames=("h1",))
def gcn_forward(a_pad, pslab, X, *, h1):
    """a_pad / pslab come from prepare_gcn (hoisted).  X: (B, n) per call."""
    B, n = X.shape
    npad = a_pad.shape[0]
    b_pad = _round_up(max(B, 8), 8)
    xt = jnp.pad(X.T.astype(jnp.float32), ((0, npad - n), (0, XL - B)))

    vmem = pl.BlockSpec(memory_space=pltpu.MemorySpace.VMEM)
    out = pl.pallas_call(
        partial(_gcn_kernel, n=n, batch=B, b_pad=b_pad),
        out_shape=jax.ShapeDtypeStruct((b_pad, CP), jnp.float32),
        in_specs=[vmem, vmem, vmem],
        out_specs=vmem,
    )(a_pad, xt, pslab)
    # NOTE: single VMEM block, no grid (B*n is tiny).  For large B*n, shard a
    # batch grid axis "parallel" across v7x's two TensorCores and switch BN
    # statistics to a two-pass (cross-tile accumulate) scheme.
    return out[:B, :h1]


def init_params(key, hidden):
    """Kipf-style GraphConvolution init plus BN affine params.  gc biases are
    only used by the pure-JAX reference — the kernel drops them (BN-cancelled)."""
    h0, h1 = hidden
    ks = jax.random.split(key, 8)
    s1 = 1.0 / float(jnp.sqrt(jnp.float32(h0)))
    s2 = 1.0 / float(jnp.sqrt(jnp.float32(h1)))
    return {
        "w1": jax.random.uniform(ks[0], (1, h0), jnp.float32, -s1, s1),
        "b1": jax.random.uniform(ks[1], (h0,), jnp.float32, -s1, s1),
        "w2": jax.random.uniform(ks[2], (h0, h1), jnp.float32, -s2, s2),
        "b2": jax.random.uniform(ks[3], (h1,), jnp.float32, -s2, s2),
        "g1": jax.random.uniform(ks[4], (h0,), jnp.float32, 0.5, 1.5),
        "be1": jax.random.uniform(ks[5], (h0,), jnp.float32, -0.5, 0.5),
        "g2": jax.random.uniform(ks[6], (h1,), jnp.float32, 0.5, 1.5),
        "be2": jax.random.uniform(ks[7], (h1,), jnp.float32, -0.5, 0.5),
    }


def _reference(A, X, p):
    """Pure-JAX mirror of GCN_loading.forward (train-mode BN, relu, dp=0),
    including the gc biases the kernel drops (to verify BN cancellation)."""
    def bn(h, g, be):          # h: (B, n, C); BatchNorm1d over (B, n) per channel
        mu = jnp.mean(h, axis=(0, 1), keepdims=True)
        var = jnp.mean((h - mu) ** 2, axis=(0, 1), keepdims=True)
        return (h - mu) / jnp.sqrt(var + EPS) * g + be

    H = X[..., None]                                            # (B, n, 1)
    H = jnp.einsum("ij,bjc->bic", A, H @ p["w1"]) + p["b1"]     # gc1
    H = jnp.maximum(bn(H, p["g1"], p["be1"]), 0.0)
    H = jnp.einsum("ij,bjc->bic", A, H @ p["w2"]) + p["b2"]     # gc2
    H = jnp.maximum(bn(H, p["g2"], p["be2"]), 0.0)
    return jnp.mean(H, axis=1)                                  # (B, h1)


if __name__ == "__main__":
    key = jax.random.PRNGKey(0)
    k_adj, k_x, k_p = jax.random.split(key, 3)

    B, n = 4, 16                 # graphs per batch, nodes per graph
    hidden = (32, 32)            # hidden_features[0], hidden_features[1]

    # symmetric, self-looped, symmetrically-normalized adjacency
    raw = jax.random.uniform(k_adj, (n, n))
    adj = jnp.where(raw + raw.T > 1.0, 1.0, 0.0)
    adj = jnp.where(jnp.eye(n, dtype=bool), 1.0, adj)
    dinv = jax.lax.rsqrt(jnp.sum(adj, axis=1))
    A = (adj * dinv[:, None] * dinv[None, :]).astype(jnp.float32)

    X = jax.random.normal(k_x, (B, n), jnp.float32)
    params = init_params(k_p, hidden)

    # Static packing hoisted out of the per-call path (done exactly once).
    a_pad, pslab = jax.block_until_ready(prepare_gcn(A, params))

    out = jax.block_until_ready(gcn_forward(a_pad, pslab, X, h1=hidden[1]))
    ref = _reference(A, X, params)

    assert out.shape == (B, hidden[1])
    assert jnp.allclose(out, ref, atol=1e-3, rtol=1e-3), \
        float(jnp.max(jnp.abs(out - ref)))

    print("KERNEL_OK")
</pallas_src>

<mosaic_0001>
module attributes {stable_mosaic.version = 11 : i64} {
  func.func @_gcn_kernel(%arg0: memref<16x16xf32, #tpu.memory_space<vmem>>, %arg1: memref<16x128xf32, #tpu.memory_space<vmem>>, %arg2: memref<136x128xf32, #tpu.memory_space<vmem>>, %arg3: memref<8x128xf32, #tpu.memory_space<vmem>>) attributes {dimension_semantics = [], scalar_prefetch = 0 : i64, scratch_operands = 0 : i64, tpu.core_type = #tpu.core_type<tc>} {
    %c0 = arith.constant 0 : index
    %c0_0 = arith.constant 0 : index
    %0 = vector.load %arg0[%c0, %c0_0] : memref<16x16xf32, #tpu.memory_space<vmem>>, vector<16x16xf32>
    %c0_1 = arith.constant 0 : index
    %c0_2 = arith.constant 0 : index
    %1 = vector.load %arg2[%c0_1, %c0_2] : memref<136x128xf32, #tpu.memory_space<vmem>>, vector<1x128xf32>
    %c1 = arith.constant 1 : index
    %c0_3 = arith.constant 0 : index
    %2 = vector.load %arg2[%c1, %c0_3] : memref<136x128xf32, #tpu.memory_space<vmem>>, vector<1x128xf32>
    %c2 = arith.constant 2 : index
    %c0_4 = arith.constant 0 : index
    %3 = vector.load %arg2[%c2, %c0_4] : memref<136x128xf32, #tpu.memory_space<vmem>>, vector<1x128xf32>
    %c3 = arith.constant 3 : index
    %c0_5 = arith.constant 0 : index
    %4 = vector.load %arg2[%c3, %c0_5] : memref<136x128xf32, #tpu.memory_space<vmem>>, vector<1x128xf32>
    %c4 = arith.constant 4 : index
    %c0_6 = arith.constant 0 : index
    %5 = vector.load %arg2[%c4, %c0_6] : memref<136x128xf32, #tpu.memory_space<vmem>>, vector<1x128xf32>
    %c8 = arith.constant 8 : index
    %c0_7 = arith.constant 0 : index
    %6 = vector.load %arg2[%c8, %c0_7] : memref<136x128xf32, #tpu.memory_space<vmem>>, vector<128x128xf32>
    %c0_8 = arith.constant 0 : index
    %c0_9 = arith.constant 0 : index
    %7 = vector.load %arg1[%c0_8, %c0_9] : memref<16x128xf32, #tpu.memory_space<vmem>>, vector<16x128xf32>
    %cst = arith.constant dense<0.000000e+00> : vector<16x128xf32>
    %8 = tpu.matmul %0, %7, %cst {dimension_numbers = #tpu.dot_dimension_numbers<[1], [0], [0], [1], [0, 0, 1, 1], [], []>} : vector<16x16xf32>, vector<16x128xf32>, vector<16x128xf32> -> vector<16x128xf32>
    %9 = vector.shape_cast %8 : vector<16x128xf32> to vector<1x16x128xf32>
    %cst_10 = arith.constant dense<0.000000e+00> : vector<1xf32>
    %10 = vector.multi_reduction <add>, %9, %cst_10 [1, 2] : vector<1x16x128xf32> to vector<1xf32>
    %11 = vector.shape_cast %10 : vector<1xf32> to vector<1x1x1xf32>
    %12 = vector.extract %11[0, 0, 0] : f32 from vector<1x1x1xf32>
    %cst_11 = arith.constant 1.562500e-02 : f32
    %13 = arith.mulf %12, %cst_11 : f32
    %14 = arith.mulf %8, %8 : vector<16x128xf32>
    %15 = vector.shape_cast %14 : vector<16x128xf32> to vector<1x16x128xf32>
    %cst_12 = arith.constant dense<0.000000e+00> : vector<1xf32>
    %16 = vector.multi_reduction <add>, %15, %cst_12 [1, 2] : vector<1x16x128xf32> to vector<1xf32>
    %17 = vector.shape_cast %16 : vector<1xf32> to vector<1x1x1xf32>
    %18 = vector.extract %17[0, 0, 0] : f32 from vector<1x1x1xf32>
    %cst_13 = arith.constant 1.562500e-02 : f32
    %19 = arith.mulf %18, %cst_13 : f32
    %20 = arith.mulf %13, %13 : f32
    %21 = arith.subf %19, %20 : f32
    %cst_14 = arith.constant 0.000000e+00 : f32
    %22 = arith.maximumf %21, %cst_14 : f32
    %23 = arith.mulf %1, %1 : vector<1x128xf32>
    %24 = vector.broadcast %22 : f32 to vector<1x128xf32>
    %25 = arith.mulf %23, %24 : vector<1x128xf32>
    %cst_15 = arith.constant 9.99999974E-6 : f32
    %26 = vector.broadcast %cst_15 : f32 to vector<1x128xf32>
    %27 = arith.addf %25, %26 : vector<1x128xf32>
    %28 = math.rsqrt %27 : vector<1x128xf32>
    %29 = arith.mulf %2, %28 : vector<1x128xf32>
    %30 = arith.mulf %1, %29 : vector<1x128xf32>
    %31 = vector.broadcast %13 : f32 to vector<1x128xf32>
    %32 = arith.mulf %31, %30 : vector<1x128xf32>
    %33 = arith.subf %3, %32 : vector<1x128xf32>
    %34 = vector.extract_strided_slice %8 {offsets = [0, 0], sizes = [16, 1], strides = [1, 1]} : vector<16x128xf32> to vector<16x1xf32>
    %35 = vector.broadcast %34 : vector<16x1xf32> to vector<16x128xf32>
    %36 = vector.broadcast %30 : vector<1x128xf32> to vector<16x128xf32>
    %37 = arith.mulf %35, %36 : vector<16x128xf32>
    %38 = vector.broadcast %33 : vector<1x128xf32> to vector<16x128xf32>
    %39 = arith.addf %37, %38 : vector<16x128xf32>
    %cst_16 = arith.constant 0.000000e+00 : f32
    %40 = vector.broadcast %cst_16 : f32 to vector<16x128xf32>
    %41 = arith.maximumf %39, %40 : vector<16x128xf32>
    %cst_17 = arith.constant dense<0.000000e+00> : vector<16x128xf32>
    %42 = tpu.matmul %41, %6, %cst_17 {dimension_numbers = #tpu.dot_dimension_numbers<[1], [0], [0], [1], [0, 0, 1, 1], [], []>} : vector<16x128xf32>, vector<128x128xf32>, vector<16x128xf32> -> vector<16x128xf32>
    %43 = vector.extract_strided_slice %8 {offsets = [0, 1], sizes = [16, 1], strides = [1, 1]} : vector<16x128xf32> to vector<16x1xf32>
    %44 = vector.broadcast %43 : vector<16x1xf32> to vector<16x128xf32>
    %45 = vector.broadcast %30 : vector<1x128xf32> to vector<16x128xf32>
    %46 = arith.mulf %44, %45 : vector<16x128xf32>
    %47 = vector.broadcast %33 : vector<1x128xf32> to vector<16x128xf32>
    %48 = arith.addf %46, %47 : vector<16x128xf32>
    %cst_18 = arith.constant 0.000000e+00 : f32
    %49 = vector.broadcast %cst_18 : f32 to vector<16x128xf32>
    %50 = arith.maximumf %48, %49 : vector<16x128xf32>
    %cst_19 = arith.constant dense<0.000000e+00> : vector<16x128xf32>
    %51 = tpu.matmul %50, %6, %cst_19 {dimension_numbers = #tpu.dot_dimension_numbers<[1], [0], [0], [1], [0, 0, 1, 1], [], []>} : vector<16x128xf32>, vector<128x128xf32>, vector<16x128xf32> -> vector<16x128xf32>
    %52 = vector.extract_strided_slice %8 {offsets = [0, 2], sizes = [16, 1], strides = [1, 1]} : vector<16x128xf32> to vector<16x1xf32>
    %53 = vector.broadcast %52 : vector<16x1xf32> to vector<16x128xf32>
    %54 = vector.broadcast %30 : vector<1x128xf32> to vector<16x128xf32>
    %55 = arith.mulf %53, %54 : vector<16x128xf32>
    %56 = vector.broadcast %33 : vector<1x128xf32> to vector<16x128xf32>
    %57 = arith.addf %55, %56 : vector<16x128xf32>
    %cst_20 = arith.constant 0.000000e+00 : f32
    %58 = vector.broadcast %cst_20 : f32 to vector<16x128xf32>
    %59 = arith.maximumf %57, %58 : vector<16x128xf32>
    %cst_21 = arith.constant dense<0.000000e+00> : vector<16x128xf32>
    %60 = tpu.matmul %59, %6, %cst_21 {dimension_numbers = #tpu.dot_dimension_numbers<[1], [0], [0], [1], [0, 0, 1, 1], [], []>} : vector<16x128xf32>, vector<128x128xf32>, vector<16x128xf32> -> vector<16x128xf32>
    %61 = vector.extract_strided_slice %8 {offsets = [0, 3], sizes = [16, 1], strides = [1, 1]} : vector<16x128xf32> to vector<16x1xf32>
    %62 = vector.broadcast %61 : vector<16x1xf32> to vector<16x128xf32>
    %63 = vector.broadcast %30 : vector<1x128xf32> to vector<16x128xf32>
    %64 = arith.mulf %62, %63 : vector<16x128xf32>
    %65 = vector.broadcast %33 : vector<1x128xf32> to vector<16x128xf32>
    %66 = arith.addf %64, %65 : vector<16x128xf32>
    %cst_22 = arith.constant 0.000000e+00 : f32
    %67 = vector.broadcast %cst_22 : f32 to vector<16x128xf32>
    %68 = arith.maximumf %66, %67 : vector<16x128xf32>
    %cst_23 = arith.constant dense<0.000000e+00> : vector<16x128xf32>
    %69 = tpu.matmul %68, %6, %cst_23 {dimension_numbers = #tpu.dot_dimension_numbers<[1], [0], [0], [1], [0, 0, 1, 1], [], []>} : vector<16x128xf32>, vector<128x128xf32>, vector<16x128xf32> -> vector<16x128xf32>
    %70 = tpu.concatenate %42, %51, %60, %69 in 1 : vector<16x128xf32>, vector<16x128xf32>, vector<16x128xf32>, vector<16x128xf32> -> vector<16x512xf32>
    %cst_24 = arith.constant dense<0.000000e+00> : vector<16x512xf32>
    %71 = tpu.matmul %0, %70, %cst_24 {dimension_numbers = #tpu.dot_dimension_numbers<[1], [0], [0], [1], [0, 0, 1, 1], [], []>} : vector<16x16xf32>, vector<16x512xf32>, vector<16x512xf32> -> vector<16x512xf32>
    %cst_25 = arith.constant 0.000000e+00 : f32
    %72 = vector.broadcast %cst_25 : f32 to vector<1x128xf32>
    %cst_26 = arith.constant 0.000000e+00 : f32
    %73 = vector.broadcast %cst_26 : f32 to vector<1x128xf32>
    %74 = vector.extract_strided_slice %71 {offsets = [0, 0], sizes = [16, 128], strides = [1, 1]} : vector<16x512xf32> to vector<16x128xf32>
    %cst_27 = arith.constant dense<0.000000e+00> : vector<128xf32>
    %75 = vector.multi_reduction <add>, %74, %cst_27 [0] : vector<16x128xf32> to vector<128xf32>
    %76 = vector.shape_cast %75 : vector<128xf32> to vector<1x128xf32>
    %77 = arith.addf %72, %76 : vector<1x128xf32>
    %78 = arith.mulf %74, %74 : vector<16x128xf32>
    %cst_28 = arith.constant dense<0.000000e+00> : vector<128xf32>
    %79 = vector.multi_reduction <add>, %78, %cst_28 [0] : vector<16x128xf32> to vector<128xf32>
    %80 = vector.shape_cast %79 : vector<128xf32> to vector<1x128xf32>
    %81 = arith.addf %73, %80 : vector<1x128xf32>
    %82 = vector.extract_strided_slice %71 {offsets = [0, 128], sizes = [16, 128], strides = [1, 1]} : vector<16x512xf32> to vector<16x128xf32>
    %cst_29 = arith.constant dense<0.000000e+00> : vector<128xf32>
    %83 = vector.multi_reduction <add>, %82, %cst_29 [0] : vector<16x128xf32> to vector<128xf32>
    %84 = vector.shape_cast %83 : vector<128xf32> to vector<1x128xf32>
    %85 = arith.addf %77, %84 : vector<1x128xf32>
    %86 = arith.mulf %82, %82 : vector<16x128xf32>
    %cst_30 = arith.constant dense<0.000000e+00> : vector<128xf32>
    %87 = vector.multi_reduction <add>, %86, %cst_30 [0] : vector<16x128xf32> to vector<128xf32>
    %88 = vector.shape_cast %87 : vector<128xf32> to vector<1x128xf32>
    %89 = arith.addf %81, %88 : vector<1x128xf32>
    %90 = vector.extract_strided_slice %71 {offsets = [0, 256], sizes = [16, 128], strides = [1, 1]} : vector<16x512xf32> to vector<16x128xf32>
    %cst_31 = arith.constant dense<0.000000e+00> : vector<128xf32>
    %91 = vector.multi_reduction <add>, %90, %cst_31 [0] : vector<16x128xf32> to vector<128xf32>
    %92 = vector.shape_cast %91 : vector<128xf32> to vector<1x128xf32>
    %93 = arith.addf %85, %92 : vector<1x128xf32>
    %94 = arith.mulf %90, %90 : vector<16x128xf32>
    %cst_32 = arith.constant dense<0.000000e+00> : vector<128xf32>
    %95 = vector.multi_reduction <add>, %94, %cst_32 [0] : vector<16x128xf32> to vector<128xf32>
    %96 = vector.shape_cast %95 : vector<128xf32> to vector<1x128xf32>
    %97 = arith.addf %89, %96 : vector<1x128xf32>
    %98 = vector.extract_strided_slice %71 {offsets = [0, 384], sizes = [16, 128], strides = [1, 1]} : vector<16x512xf32> to vector<16x128xf32>
    %cst_33 = arith.constant dense<0.000000e+00> : vector<128xf32>
    %99 = vector.multi_reduction <add>, %98, %cst_33 [0] : vector<16x128xf32> to vector<128xf32>
    %100 = vector.shape_cast %99 : vector<128xf32> to vector<1x128xf32>
    %101 = arith.addf %93, %100 : vector<1x128xf32>
    %102 = arith.mulf %98, %98 : vector<16x128xf32>
    %cst_34 = arith.constant dense<0.000000e+00> : vector<128xf32>
    %103 = vector.multi_reduction <add>, %102, %cst_34 [0] : vector<16x128xf32> to vector<128xf32>
    %104 = vector.shape_cast %103 : vector<128xf32> to vector<1x128xf32>
    %105 = arith.addf %97, %104 : vector<1x128xf32>
    %cst_35 = arith.constant 1.562500e-02 : f32
    %106 = vector.broadcast %cst_35 : f32 to vector<1x128xf32>
    %107 = arith.mulf %101, %106 : vector<1x128xf32>
    %cst_36 = arith.constant 1.562500e-02 : f32
    %108 = vector.broadcast %cst_36 : f32 to vector<1x128xf32>
    %109 = arith.mulf %105, %108 : vector<1x128xf32>
    %110 = arith.mulf %107, %107 : vector<1x128xf32>
    %111 = arith.subf %109, %110 : vector<1x128xf32>
    %cst_37 = arith.constant 0.000000e+00 : f32
    %112 = vector.broadcast %cst_37 : f32 to vector<1x128xf32>
    %113 = arith.maximumf %111, %112 : vector<1x128xf32>
    %cst_38 = arith.constant 9.99999974E-6 : f32
    %114 = vector.broadcast %cst_38 : f32 to vector<1x128xf32>
    %115 = arith.addf %113, %114 : vector<1x128xf32>
    %116 = math.rsqrt %115 : vector<1x128xf32>
    %117 = arith.mulf %4, %116 : vector<1x128xf32>
    %118 = arith.mulf %107, %117 : vector<1x128xf32>
    %119 = arith.subf %5, %118 : vector<1x128xf32>
    %120 = vector.extract_strided_slice %71 {offsets = [0, 0], sizes = [16, 128], strides = [1, 1]} : vector<16x512xf32> to vector<16x128xf32>
    %121 = vector.broadcast %117 : vector<1x128xf32> to vector<16x128xf32>
    %122 = arith.mulf %120, %121 : vector<16x128xf32>
    %123 = vector.broadcast %119 : vector<1x128xf32> to vector<16x128xf32>
    %124 = arith.addf %122, %123 : vector<16x128xf32>
    %cst_39 = arith.constant 0.000000e+00 : f32
    %125 = vector.broadcast %cst_39 : f32 to vector<16x128xf32>
    %126 = arith.maximumf %124, %125 : vector<16x128xf32>
    %cst_40 = arith.constant dense<0.000000e+00> : vector<128xf32>
    %127 = vector.multi_reduction <add>, %126, %cst_40 [0] : vector<16x128xf32> to vector<128xf32>
    %128 = vector.shape_cast %127 : vector<128xf32> to vector<1x128xf32>
    %cst_41 = arith.constant 6.250000e-02 : f32
    %129 = vector.broadcast %cst_41 : f32 to vector<1x128xf32>
    %130 = arith.mulf %128, %129 : vector<1x128xf32>
    %131 = vector.extract_strided_slice %71 {offsets = [0, 128], sizes = [16, 128], strides = [1, 1]} : vector<16x512xf32> to vector<16x128xf32>
    %132 = vector.broadcast %117 : vector<1x128xf32> to vector<16x128xf32>
    %133 = arith.mulf %131, %132 : vector<16x128xf32>
    %134 = vector.broadcast %119 : vector<1x128xf32> to vector<16x128xf32>
    %135 = arith.addf %133, %134 : vector<16x128xf32>
    %cst_42 = arith.constant 0.000000e+00 : f32
    %136 = vector.broadcast %cst_42 : f32 to vector<16x128xf32>
    %137 = arith.maximumf %135, %136 : vector<16x128xf32>
    %cst_43 = arith.constant dense<0.000000e+00> : vector<128xf32>
    %138 = vector.multi_reduction <add>, %137, %cst_43 [0] : vector<16x128xf32> to vector<128xf32>
    %139 = vector.shape_cast %138 : vector<128xf32> to vector<1x128xf32>
    %cst_44 = arith.constant 6.250000e-02 : f32
    %140 = vector.broadcast %cst_44 : f32 to vector<1x128xf32>
    %141 = arith.mulf %139, %140 : vector<1x128xf32>
    %142 = vector.extract_strided_slice %71 {offsets = [0, 256], sizes = [16, 128], strides = [1, 1]} : vector<16x512xf32> to vector<16x128xf32>
    %143 = vector.broadcast %117 : vector<1x128xf32> to vector<16x128xf32>
    %144 = arith.mulf %142, %143 : vector<16x128xf32>
    %145 = vector.broadcast %119 : vector<1x128xf32> to vector<16x128xf32>
    %146 = arith.addf %144, %145 : vector<16x128xf32>
    %cst_45 = arith.constant 0.000000e+00 : f32
    %147 = vector.broadcast %cst_45 : f32 to vector<16x128xf32>
    %148 = arith.maximumf %146, %147 : vector<16x128xf32>
    %cst_46 = arith.constant dense<0.000000e+00> : vector<128xf32>
    %149 = vector.multi_reduction <add>, %148, %cst_46 [0] : vector<16x128xf32> to vector<128xf32>
    %150 = vector.shape_cast %149 : vector<128xf32> to vector<1x128xf32>
    %cst_47 = arith.constant 6.250000e-02 : f32
    %151 = vector.broadcast %cst_47 : f32 to vector<1x128xf32>
    %152 = arith.mulf %150, %151 : vector<1x128xf32>
    %153 = vector.extract_strided_slice %71 {offsets = [0, 384], sizes = [16, 128], strides = [1, 1]} : vector<16x512xf32> to vector<16x128xf32>
    %154 = vector.broadcast %117 : vector<1x128xf32> to vector<16x128xf32>
    %155 = arith.mulf %153, %154 : vector<16x128xf32>
    %156 = vector.broadcast %119 : vector<1x128xf32> to vector<16x128xf32>
    %157 = arith.addf %155, %156 : vector<16x128xf32>
    %cst_48 = arith.constant 0.000000e+00 : f32
    %158 = vector.broadcast %cst_48 : f32 to vector<16x128xf32>
    %159 = arith.maximumf %157, %158 : vector<16x128xf32>
    %cst_49 = arith.constant dense<0.000000e+00> : vector<128xf32>
    %160 = vector.multi_reduction <add>, %159, %cst_49 [0] : vector<16x128xf32> to vector<128xf32>
    %161 = vector.shape_cast %160 : vector<128xf32> to vector<1x128xf32>
    %cst_50 = arith.constant 6.250000e-02 : f32
    %162 = vector.broadcast %cst_50 : f32 to vector<1x128xf32>
    %163 = arith.mulf %161, %162 : vector<1x128xf32>
    %cst_51 = arith.constant 0.000000e+00 : f32
    %164 = vector.broadcast %cst_51 : f32 to vector<4x128xf32>
    %165 = tpu.concatenate %130, %141, %152, %163, %164 in 0 : vector<1x128xf32>, vector<1x128xf32>, vector<1x128xf32>, vector<1x128xf32>, vector<4x128xf32> -> vector<8x128xf32>
    %c0_52 = arith.constant 0 : index
    %c0_53 = arith.constant 0 : index
    %166 = vector.load %arg3[%c0_52, %c0_53] : memref<8x128xf32, #tpu.memory_space<vmem>>, vector<8x128xf32>
    tpu.vector_store %arg3[%c0_52, %c0_53], %165 {strides = array<i32>} : memref<8x128xf32, #tpu.memory_space<vmem>>, vector<8x128xf32>,
    return
  }
}

</mosaic_0001>

<bundles_post_ra>
// kernel: gcn_forward.1
= control target key start
LH: loop header
LB: loop body
LE: loop exit
PB: predicated region body
PF: predicated region fallthrough
CT: control target
= control target key end

     0   :  { %8 = vsyncpa [#allocation3], 0  ;;  %s1128_s12 = smov [#allocation2]   ;;  %s1425_s0 = inlined_call_operand.vmem [shape: f32[16,16], index: 0, kind: input, shape index: {}]   ;;  %s1426_s1 = inlined_call_operand.vmem [shape: f32[16,128], index: 1, kind: input, shape index: {}]   ;;  %s1427_s2 = inlined_call_operand.hbm [shape: f32[136,128], index: 2, kind: input, shape index: {}]   ;;  %s1428_s3 = inlined_call_operand.vmem [shape: f32[8,128], index: 3, kind: output, shape index: {}]  }
   0x1   :  { %s18_s13 = sshll.u32 %s1128_s12, 4  ;;  %s19_s13 = int_to_ptr.vmem [resolvable:$true] %s18_s13 }
   0x2   :  { %s1114_s14 = scalar_lea.vmem %s19_s13, 2176  ;;  %p1119_p1 = scmp.lt.s32.totalorder %s19_s13, %s19_s13 }
   0x3   :  { %p1115_p0 = scmp.ne.s32.totalorder %s19_s13, %s1114_s14  ;;  %p1120_p2 = scmp.lt.s32.totalorder %s1114_s14, %s1114_s14 }
   0x5   :  { %p1121_p3 = por %p1120_p2, %p1119_p1 }
   0x7   :  { %p1122_p4 = pnand %p1121_p3, %p1115_p0 }
   0x9   :  { %1125 = shalt.err (!%p1122_p4)
}
   0xa   :  { %s1129_s15 = smov 128   ;;  %s1130_s16 = smov 8  }
   0xb   :  { %24 = dma.hbm_to_vmem [thread:$0]  %s1427_s2, 2176, %s19_s13, [#allocation3], %s1129_s15, %s1129_s15, %s1130_s16  }
   0xc   :  { %1126 = dma.done.wait [#allocation3], 2176  }
   0xd   :  { %1127 = vsyncadd [#allocation3], 4294965120  ;;  %vm53_vm0 = vcmask 130048   ;;  %v52_v0 = vld [vmem:[%s1426_s1 + $0x8] sm:$0xff]  ;;  %v51_v1 = vld [vmem:[%s1426_s1] sm:$0xff]  ;;  %v1131_v4 = vmov 1   ;;  %v182_v51 = vlaneseq }
   0xe   :  { %v1169_v2 = vld [vmem:[%s1425_s0] sm:$0xff]  ;;  %934 = vmatprep.subr.mxu0 %v52_v0  ;;  %v1176_v3 = vld [vmem:[%s1425_s0 + $0x8] sm:$0xff]  ;;  %1094 = vset.pattern.permute.xlu1 %v1131_v4  ;;  %v1132_v10 = vmov 0   ;;  %v1133_v12 = vmov 3   ;;  %v1134_v13 = vmov 2   ;;  %v1186_v15 = vld [vmem:[#allocation2 + $0x78] sm:$0xff] }
   0xf   :  { %938 = vmatprep.mubr.msk.f32.mxu0 %vm53_vm0, %v1169_v2  ;;  %935 = vmatpush3.msra.mxu0 %v52_v0  ;;  %v1180_v14 = vld [vmem:[#allocation2 + $0x80] sm:$0xff]  ;;  %v1192_v16 = vld [vmem:[#allocation2 + $0x70] sm:$0xff]  ;;  %v1198_v17 = vld [vmem:[#allocation2 + $0x68] sm:$0xff]  ;;  %s1135_s30 = smov 0.0   ;;  %v183_v53 = vshrl.u32 %v182_v51, 7  ;;  %vm838_vm1 = vcmask 1040384  }
  0x10   :  { %936 = vmatprep.subr.mxu0 %v51_v1  ;;  %1096 = vset.pattern.permute.xlu0 %v1131_v4  ;;  %v1204_v18 = vld [vmem:[#allocation2 + $0x60] sm:$0xff]  ;;  %v1210_v19 = vld [vmem:[#allocation2 + $0x58] sm:$0xff]  ;;  %v1216_v20 = vld [vmem:[#allocation2 + $0x50] sm:$0xff]  ;;  %vm840_vm2 = vcmask 1041408   ;;  %vm842_vm3 = vcmask 1042432   ;;  %vm844_vm4 = vcmask 1043456  }
  0x11   :  { %937 = vmatpush3.msra.mxu0 %v51_v1  ;;  %941 = vmatprep.subr.mxu1 %v1180_v14  ;;  %v1222_v21 = vld [vmem:[#allocation2 + $0x48] sm:$0xff]  ;;  %v1228_v22 = vld [vmem:[#allocation2 + $0x40] sm:$0xff]  ;;  %v1234_v23 = vld [vmem:[#allocation2 + $0x38] sm:$0xff]  ;;  %v1278_v57 = vsub.s32 0, %v183_v53 }
  0x12   :  { %939 = vmatmul.mubr.msk.f32.vlgmr.msra.gmra.mxu0 %vm53_vm0, %v1176_v3  ;;  %976 = vmatprep.subr.mxu0 %v1180_v14  ;;  %v1240_v24 = vld [vmem:[#allocation2 + $0x30] sm:$0xff]  ;;  %v1246_v25 = vld [vmem:[#allocation2 + $0x28] sm:$0xff]  ;;  %v1252_v26 = vld [vmem:[#allocation2 + $0x20] sm:$0xff] }
  0x13   :  { %942 = vmatpush3.msra.mxu1 %v1180_v14  ;;  %977 = vmatpush3.msra.mxu0 %v1180_v14  ;;  %v1258_v27 = vld [vmem:[#allocation2 + $0x18] sm:$0xff]  ;;  %v1262_v28 = vld [vmem:[#allocation2 + $0x10] sm:$0xff]  ;;  %v1266_v29 = vld [vmem:[#allocation2 + $0x8] sm:$0xff] }
  0x14   :  { %943 = vmatprep.subr.mxu1 %v1186_v15  ;;  %978 = vmatprep.subr.mxu0 %v1186_v15  ;;  %v30_v44 = vld [vmem:[#allocation2] sm:$0x1]  ;;  %v31_v54 = vld [vmem:[#allocation2 + $0x1] sm:$0x1]  ;;  %v32_v61 = vld [vmem:[#allocation2 + $0x2] sm:$0x1] }
  0x15   :  { %944 = vmatpush3.msra.mxu1 %v1186_v15  ;;  %979 = vmatpush3.msra.mxu0 %v1186_v15  ;;  %v162_v45 = vmul.f32 %v30_v44, %v30_v44 }
  0x16   :  { %945 = vmatprep.subr.mxu1 %v1192_v16  ;;  %980 = vmatprep.subr.mxu0 %v1192_v16 }
  0x17   :  { %946 = vmatpush3.msra.mxu1 %v1192_v16  ;;  %981 = vmatpush3.msra.mxu0 %v1192_v16 }
  0x18   :  { %947 = vmatprep.subr.mxu1 %v1198_v17  ;;  %982 = vmatprep.subr.mxu0 %v1198_v17 }
  0x19   :  { %948 = vmatpush3.msra.mxu1 %v1198_v17  ;;  %983 = vmatpush3.msra.mxu0 %v1198_v17 }
  0x1a   :  { %949 = vmatprep.subr.mxu1 %v1204_v18  ;;  %984 = vmatprep.subr.mxu0 %v1204_v18 }
  0x1b   :  { %950 = vmatpush3.msra.mxu1 %v1204_v18  ;;  %985 = vmatpush3.msra.mxu0 %v1204_v18 }
  0x1c   :  { %951 = vmatprep.subr.mxu1 %v1210_v19  ;;  %986 = vmatprep.subr.mxu0 %v1210_v19 }
  0x1d   :  { %952 = vmatpush3.msra.mxu1 %v1210_v19  ;;  %987 = vmatpush3.msra.mxu0 %v1210_v19 }
  0x1e   :  { %953 = vmatprep.subr.mxu1 %v1216_v20  ;;  %988 = vmatprep.subr.mxu0 %v1216_v20 }
  0x1f   :  { %954 = vmatpush3.msra.mxu1 %v1216_v20  ;;  %989 = vmatpush3.msra.mxu0 %v1216_v20 }
  0x20   :  { %955 = vmatprep.subr.mxu1 %v1222_v21  ;;  %990 = vmatprep.subr.mxu0 %v1222_v21 }
  0x21   :  { %956 = vmatpush3.msra.mxu1 %v1222_v21  ;;  %991 = vmatpush3.msra.mxu0 %v1222_v21 }
  0x22   :  { %957 = vmatprep.subr.mxu1 %v1228_v22  ;;  %992 = vmatprep.subr.mxu0 %v1228_v22 }
  0x23   :  { %958 = vmatpush3.msra.mxu1 %v1228_v22  ;;  %993 = vmatpush3.msra.mxu0 %v1228_v22 }
  0x24   :  { %959 = vmatprep.subr.mxu1 %v1234_v23  ;;  %994 = vmatprep.subr.mxu0 %v1234_v23 }
  0x25   :  { %960 = vmatpush3.msra.mxu1 %v1234_v23  ;;  %995 = vmatpush3.msra.mxu0 %v1234_v23 }
  0x26   :  { %961 = vmatprep.subr.mxu1 %v1240_v24  ;;  %996 = vmatprep.subr.mxu0 %v1240_v24 }
  0x27   :  { %962 = vmatpush3.msra.mxu1 %v1240_v24  ;;  %997 = vmatpush3.msra.mxu0 %v1240_v24 }
  0x28   :  { %963 = vmatprep.subr.mxu1 %v1246_v25  ;;  %998 = vmatprep.subr.mxu0 %v1246_v25 }
  0x29   :  { %964 = vmatpush3.msra.mxu1 %v1246_v25  ;;  %999 = vmatpush3.msra.mxu0 %v1246_v25 }
  0x2a   :  { %965 = vmatprep.subr.mxu1 %v1252_v26  ;;  %1000 = vmatprep.subr.mxu0 %v1252_v26 }
  0x2b   :  { %966 = vmatpush3.msra.mxu1 %v1252_v26  ;;  %1001 = vmatpush3.msra.mxu0 %v1252_v26 }
  0x2c   :  { %967 = vmatprep.subr.mxu1 %v1258_v27  ;;  %1002 = vmatprep.subr.mxu0 %v1258_v27 }
  0x2d   :  { %968 = vmatpush3.msra.mxu1 %v1258_v27  ;;  %1003 = vmatpush3.msra.mxu0 %v1258_v27 }
  0x2e   :  { %969 = vmatprep.subr.mxu1 %v1262_v28  ;;  %1004 = vmatprep.subr.mxu0 %v1262_v28 }
  0x2f   :  { %970 = vmatpush3.msra.mxu1 %v1262_v28  ;;  %1005 = vmatpush3.msra.mxu0 %v1262_v28 }
  0x30   :  { %971 = vmatprep.subr.mxu1 %v1266_v29  ;;  %1006 = vmatprep.subr.mxu0 %v1266_v29 }
  0x31   :  { %972 = vmatpush3.msra.mxu1 %v1266_v29  ;;  %1007 = vmatpush3.msra.mxu0 %v1266_v29 }
  0x32   :  { %1011 = vmatprep.subr.mxu1 %v1180_v14  ;;  %1046 = vmatprep.subr.mxu0 %v1180_v14 }
  0xd2   :  { %v940_v5 = vpop.f32.mrf.mxu0 }
  0xd3   :  { %v147_v9 = vmul.f32 %v940_v5, %v940_v5 }
  0xd4   :  { %v126_v6 = vpop.f32.mrf.mxu0 }
  0xd5   :  { %272 = vperm.xlu1 %1094, %v126_v6   ;;  %v135_v7 = vadd.f32 %v940_v5, %v126_v6  ;;  %v146_v8 = vmul.f32 %v126_v6, %v126_v6 }
  0xd7   :  { %136 = vadd.xlane.f32.xlu0 %v135_v7  ;;  %v148_v11 = vadd.f32 %v147_v9, %v146_v8 }
  0xd9   :  { %1095 = vset.pattern.permute.xlu1 %v1132_v10 }
  0xda   :  { %174 = vperm.xlu1 %1095, %v126_v6  }
  0xdb   :  { %149 = vadd.xlane.f32.xlu0 %v148_v11 }
  0xde   :  { %179 = vperm.xlu1 %1095, %v940_v5  }
  0xe2   :  { %1097 = vset.pattern.permute.xlu1 %v1133_v12 }
  0xe3   :  { %450 = vperm.xlu1 %1097, %v126_v6  }
  0xe7   :  { %1098 = vset.pattern.permute.xlu1 %v1134_v13 }
  0xe8   :  { %361 = vperm.xlu1 %1098, %v126_v6  }
  0xec   :  { %1099 = vset.pattern.permute.xlu1 %v1133_v12 }
  0xed   :  { %454 = vperm.xlu1 %1099, %v940_v5  }
  0xf1   :  { %1100 = vset.pattern.permute.xlu1 %v1134_v13  ;;  %276 = vperm.xlu0 %1096, %v940_v5  }
  0xf2   :  { %365 = vperm.xlu1 %1100, %v940_v5  }
  0xf5   :  { %1101 = vset.pattern.permute.xlu0 %v1133_v12 }
 0x150   :  { %v273_v48 = vpop.permute.xlu1 %272 }
 0x155   :  { %v175_v50 = vpop.permute.xlu1 %174 }
 0x159   :  { %v180_v52 = vpop.permute.xlu1 %179 }
 0x15e   :  { %v451_v58 = vpop.permute.xlu1 %450 }
 0x160   :  { %v137_v30 = vpop.xlane.xlu0 %136 }
 0x161   :  { %v138_v31 = vrot.slane %v137_v30, 4 }
 0x163   :  { %v139_v32 = vadd.f32 %v138_v31, %v137_v30  ;;  %v362_v5 = vpop.permute.xlu1 %361 }
 0x164   :  { %v150_v33 = vpop.xlane.xlu0 %149 }
 0x165   :  { %v140_v34 = vrot.slane %v139_v32, 2  ;;  %v151_v35 = vrot.slane %v150_v33, 4 }
 0x167   :  { %v152_v36 = vadd.f32 %v151_v35, %v150_v33  ;;  %v141_v37 = vadd.f32 %v140_v34, %v139_v32 }
 0x169   :  { %v153_v38 = vrot.slane %v152_v36, 2  ;;  %v142_v39 = vrot.slane %v141_v37, 1 }
 0x16b   :  { %v143_v40 = vadd.f32 %v142_v39, %v141_v37  ;;  %v154_v41 = vadd.f32 %v153_v38, %v152_v36 }
 0x16c   :  { %v277_v1 = vpop.permute.xlu0 %276 }
 0x16d   :  { %1081 = vpush %v143_v40  ;;  %v155_v42 = vrot.slane %v154_v41, 1 }
 0x16f   :  { %v156_v43 = vadd.f32 %v155_v42, %v154_v41 }
 0x171   :  { %1083 = vpush %v156_v43 }
 0x19e   :  { %s1082_s0 = spop %1081 }
 0x19f   :  { %s145_s1 = smul.f32 0.015625, %s1082_s0 }
 0x1a1   :  { %s159_s26 = smul.f32 %s145_s1, %s145_s1  ;;  %v169_v60 = vstv %s145_s1 }
 0x1a2   :  { %s1084_s27 = spop %1083 }
 0x1a3   :  { %s158_s28 = smul.f32 0.015625, %s1084_s27 }
 0x1a5   :  { %s160_s29 = ssub.f32 %s158_s28, %s159_s26 }
 0x1a7   :  { %s161_s4 = smax.f32 %s1135_s30, %s160_s29 }
 0x1a8   :  { %v163_v46 = vstv %s161_s4 }
 0x1a9   :  { %v164_v47 = vmul.f32 %v163_v46, %v162_v45 }
 0x1ab   :  { %v165_v49 = vadd.f32 1e-05, %v164_v47 }
 0x1ad   :  { %1102 = vrsqrt.f32 %v165_v49 }
 0x1ba   :  { %v1103_v55 = vpop.eup %1102 }
 0x1bb   :  { %v167_v56 = vmul.f32 %v1103_v55, %v31_v54 }
 0x1bd   :  { %v168_v59 = vmul.f32 %v167_v56, %v30_v44 }
 0x1bf   :  { %v170_v62 = vmul.f32 %v169_v60, %v168_v59  ;;  %v1281_v63 = vrot.slane %v168_v59, %v1278_v57 }
 0x1c1   :  { %v171_v0 = vsub.f32 %v32_v61, %v170_v62  ;;  %v186_v4 = vmul.f32 %v1281_v63, %v175_v50  ;;  %v279_v7 = vmul.f32 %v273_v48, %v1281_v63  ;;  %v187_v8 = vmul.f32 %v1281_v63, %v180_v52 }
 0x1c2   :  { %v280_v9 = vmul.f32 %v277_v1, %v1281_v63  ;;  %v368_v10 = vmul.f32 %v362_v5, %v1281_v63  ;;  %v457_v11 = vmul.f32 %v451_v58, %v1281_v63 }
 0x1c3   :  { %v1285_v6 = vrot.slane %v171_v0, %v1278_v57 }
 0x1c5   :  { %v192_v12 = vadd.f32 %v1285_v6, %v186_v4  ;;  %v281_v13 = vadd.f32 %v279_v7, %v1285_v6  ;;  %v193_v30 = vadd.f32 %v1285_v6, %v187_v8  ;;  %v282_v31 = vadd.f32 %v280_v9, %v1285_v6 }
 0x1c6   :  { %v370_v32 = vadd.f32 %v368_v10, %v1285_v6  ;;  %v459_v33 = vadd.f32 %v457_v11, %v1285_v6 }
 0x1c7   :  { %v194_v34 = vmax.f32 %v192_v12, 0.0  ;;  %v283_v35 = vmax.f32 %v281_v13, 0.0  ;;  %v195_v36 = vmax.f32 %v193_v30, 0.0  ;;  %v284_v37 = vmax.f32 %v282_v31, 0.0 }
 0x1c8   :  { %v372_v38 = vmax.f32 %v370_v32, 0.0  ;;  %v461_v39 = vmax.f32 %v459_v33, 0.0 }
 0x1c9   :  { %973 = vmatprep.mubr.f32.mxu1 %v194_v34  ;;  %1008 = vmatprep.mubr.f32.mxu0 %v283_v35 }
 0x1ca   :  { %974 = vmatmul.mubr.f32.vlgmr.msra.gmra.mxu1 %v195_v36  ;;  %1009 = vmatmul.mubr.f32.vlgmr.msra.gmra.mxu0 %v284_v37 }
 0x1cb   :  { %1012 = vmatpush3.msra.mxu1 %v1180_v14  ;;  %1047 = vmatpush3.msra.mxu0 %v1180_v14  ;;  %v455_v14 = vpop.permute.xlu1 %454 }
 0x1cc   :  { %1013 = vmatprep.subr.mxu1 %v1186_v15  ;;  %1043 = vmatprep.mubr.f32.mxu1 %v372_v38 }
 0x1cd   :  { %1048 = vmatprep.subr.mxu0 %v1186_v15  ;;  %1078 = vmatprep.mubr.f32.mxu0 %v461_v39 }
 0x1ce   :  { %1014 = vmatpush3.msra.mxu1 %v1186_v15  ;;  %1049 = vmatpush3.msra.mxu0 %v1186_v15 }
 0x1cf   :  { %1015 = vmatprep.subr.mxu1 %v1192_v16  ;;  %1050 = vmatprep.subr.mxu0 %v1192_v16  ;;  %v366_v15 = vpop.permute.xlu1 %365 }
 0x1d0   :  { %1016 = vmatpush3.msra.mxu1 %v1192_v16  ;;  %1051 = vmatpush3.msra.mxu0 %v1192_v16  ;;  %v369_v16 = vmul.f32 %v366_v15, %v1281_v63 }
 0x1d1   :  { %1017 = vmatprep.subr.mxu1 %v1198_v17  ;;  %1052 = vmatprep.subr.mxu0 %v1198_v17 }
 0x1d2   :  { %1018 = vmatpush3.msra.mxu1 %v1198_v17  ;;  %1053 = vmatpush3.msra.mxu0 %v1198_v17  ;;  %v458_v17 = vmul.f32 %v455_v14, %v1281_v63 }
 0x1d3   :  { %1019 = vmatprep.subr.mxu1 %v1204_v18  ;;  %1054 = vmatprep.subr.mxu0 %v1204_v18 }
 0x1d4   :  { %1020 = vmatpush3.msra.mxu1 %v1204_v18  ;;  %1055 = vmatpush3.msra.mxu0 %v1204_v18  ;;  %v371_v18 = vadd.f32 %v369_v16, %v1285_v6 }
 0x1d5   :  { %1021 = vmatprep.subr.mxu1 %v1210_v19  ;;  %1056 = vmatprep.subr.mxu0 %v1210_v19 }
 0x1d6   :  { %1022 = vmatpush3.msra.mxu1 %v1210_v19  ;;  %1057 = vmatpush3.msra.mxu0 %v1210_v19  ;;  %v460_v19 = vadd.f32 %v458_v17, %v1285_v6 }
 0x1d7   :  { %1023 = vmatprep.subr.mxu1 %v1216_v20  ;;  %1058 = vmatprep.subr.mxu0 %v1216_v20 }
 0x1d8   :  { %1024 = vmatpush3.msra.mxu1 %v1216_v20  ;;  %1059 = vmatpush3.msra.mxu0 %v1216_v20  ;;  %v373_v20 = vmax.f32 %v371_v18, 0.0 }
 0x1d9   :  { %1025 = vmatprep.subr.mxu1 %v1222_v21  ;;  %1060 = vmatprep.subr.mxu0 %v1222_v21 }
 0x1da   :  { %1026 = vmatpush3.msra.mxu1 %v1222_v21  ;;  %1061 = vmatpush3.msra.mxu0 %v1222_v21  ;;  %v462_v21 = vmax.f32 %v460_v19, 0.0 }
 0x1db   :  { %1027 = vmatprep.subr.mxu1 %v1228_v22  ;;  %1062 = vmatprep.subr.mxu0 %v1228_v22 }
 0x1dc   :  { %1028 = vmatpush3.msra.mxu1 %v1228_v22  ;;  %1063 = vmatpush3.msra.mxu0 %v1228_v22  ;;  %v1136_v22 = vmov 0.0  }
 0x1dd   :  { %1029 = vmatprep.subr.mxu1 %v1234_v23  ;;  %1064 = vmatprep.subr.mxu0 %v1234_v23 }
 0x1de   :  { %1030 = vmatpush3.msra.mxu1 %v1234_v23  ;;  %1065 = vmatpush3.msra.mxu0 %v1234_v23 }
 0x1df   :  { %1031 = vmatprep.subr.mxu1 %v1240_v24  ;;  %1066 = vmatprep.subr.mxu0 %v1240_v24 }
 0x1e0   :  { %1032 = vmatpush3.msra.mxu1 %v1240_v24  ;;  %1067 = vmatpush3.msra.mxu0 %v1240_v24 }
 0x1e1   :  { %1033 = vmatprep.subr.mxu1 %v1246_v25  ;;  %1068 = vmatprep.subr.mxu0 %v1246_v25 }
 0x1e2   :  { %1034 = vmatpush3.msra.mxu1 %v1246_v25  ;;  %1069 = vmatpush3.msra.mxu0 %v1246_v25 }
 0x1e3   :  { %1035 = vmatprep.subr.mxu1 %v1252_v26  ;;  %1070 = vmatprep.subr.mxu0 %v1252_v26 }
 0x1e4   :  { %1036 = vmatpush3.msra.mxu1 %v1252_v26  ;;  %1071 = vmatpush3.msra.mxu0 %v1252_v26 }
 0x1e5   :  { %1037 = vmatprep.subr.mxu1 %v1258_v27  ;;  %1072 = vmatprep.subr.mxu0 %v1258_v27 }
 0x1e6   :  { %1038 = vmatpush3.msra.mxu1 %v1258_v27  ;;  %1073 = vmatpush3.msra.mxu0 %v1258_v27 }
 0x1e7   :  { %1039 = vmatprep.subr.mxu1 %v1262_v28  ;;  %1074 = vmatprep.subr.mxu0 %v1262_v28 }
 0x1e8   :  { %1040 = vmatpush3.msra.mxu1 %v1262_v28  ;;  %1075 = vmatpush3.msra.mxu0 %v1262_v28 }
 0x1e9   :  { %1041 = vmatprep.subr.mxu1 %v1266_v29  ;;  %1076 = vmatprep.subr.mxu0 %v1266_v29 }
 0x1ea   :  { %1042 = vmatpush3.msra.mxu1 %v1266_v29  ;;  %1077 = vmatpush3.msra.mxu0 %v1266_v29 }
 0x1eb   :  { %1044 = vmatmul.mubr.f32.vlgmr.msra.gmra.mxu1 %v373_v20  ;;  %1079 = vmatmul.mubr.f32.vlgmr.msra.gmra.mxu0 %v462_v21 }
 0x1ec   :  { %602 = vmatprep.mubr.f32.mxu1 %v1136_v22  ;;  %679 = vmatprep.mubr.f32.mxu0 %v1136_v22 }
 0x28a   :  { %v975_v23 = vpop.f32.mrf.mxu1  ;;  %v1010_v24 = vpop.f32.mrf.mxu0 }
 0x28b   :  { %566 = vmatprep.subr.mxu1 %v1010_v24 }
 0x28c   :  { %v262_v25 = vpop.f32.mrf.mxu1  ;;  %v351_v26 = vpop.f32.mrf.mxu0  ;;  %567 = vmatpush1.msra.mxu1 %v975_v23 }
 0x28d   :  { %568 = vmatprep.subr.mxu1 %v351_v26 }
 0x28e   :  { %569 = vmatpush1.msra.mxu1 %v262_v25 }
 0x28f   :  { %854 = vmatmul.mubr.msk.f32.vlgmr.msra.gmra.mxu1 %vm53_vm0, %v1169_v2 }
 0x290   :  { %608 = vmatprep.mubr.f32.mxu1 %v1136_v22 }
 0x293   :  { %855 = vmatmul.mubr.msk.f32.gmra.mxu1 %vm53_vm0, %v1176_v3 }
 0x2ab   :  { %v1045_v27 = vpop.f32.mrf.mxu1  ;;  %v1080_v28 = vpop.f32.mrf.mxu0 }
 0x2ac   :  { %643 = vmatprep.subr.mxu0 %v1080_v28 }
 0x2ad   :  { %v440_v29 = vpop.f32.mrf.mxu1  ;;  %v529_v40 = vpop.f32.mrf.mxu0  ;;  %644 = vmatpush1.msra.mxu0 %v1045_v27 }
 0x2ae   :  { %645 = vmatprep.subr.mxu0 %v529_v40 }
 0x2af   :  { %646 = vmatpush1.msra.mxu0 %v440_v29 }
 0x2b0   :  { %856 = vmatmul.mubr.msk.f32.vlgmr.msra.gmra.mxu0 %vm53_vm0, %v1169_v2 }
 0x2b1   :  { %685 = vmatprep.mubr.f32.mxu0 %v1136_v22 }
 0x2b4   :  { %857 = vmatmul.mubr.msk.f32.gmra.mxu0 %vm53_vm0, %v1176_v3 }
 0x34f   :  { %v1372_v41 = vpop.f32.mrf.mxu1 }
 0x350   :  { %v700_v45 = vmul.f32 %v1372_v41, %v1372_v41 }
 0x351   :  { %v1374_v42 = vpop.f32.mrf.mxu1 }
 0x352   :  { %v718_v46 = vmul.f32 %v1374_v42, %v1374_v42 }
 0x353   :  { %v1376_v43 = vpop.f32.mrf.mxu1 }
 0x354   :  { %v701_v2 = vmul.f32 %v1376_v43, %v1376_v43  ;;  %v692_v47 = vadd.f32 %v1376_v43, %v1372_v41 }
 0x355   :  { %v1378_v44 = vpop.f32.mrf.mxu1 }
 0x356   :  { %v719_v3 = vmul.f32 %v1378_v44, %v1378_v44  ;;  %v710_v48 = vadd.f32 %v1378_v44, %v1374_v42  ;;  %v702_v49 = vadd.f32 %v701_v2, %v700_v45  ;;  %v693_v51 = vrot.slane %v692_v47, 4 }
 0x358   :  { %v720_v50 = vadd.f32 %v719_v3, %v718_v46  ;;  %v711_v52 = vrot.slane %v710_v48, 4  ;;  %v703_v53 = vrot.slane %v702_v49, 4  ;;  %v694_v55 = vadd.f32 %v693_v51, %v692_v47 }
 0x35a   :  { %v721_v54 = vrot.slane %v720_v50, 4  ;;  %v712_v56 = vadd.f32 %v711_v52, %v710_v48  ;;  %v704_v58 = vadd.f32 %v703_v53, %v702_v49  ;;  %v695_v60 = vrot.slane %v694_v55, 2 }
 0x35c   :  { %v722_v59 = vadd.f32 %v721_v54, %v720_v50  ;;  %v713_v61 = vrot.slane %v712_v56, 2  ;;  %v705_v63 = vrot.slane %v704_v58, 2  ;;  %v696_v4 = vadd.f32 %v695_v60, %v694_v55 }
 0x35e   :  { %v723_v0 = vrot.slane %v722_v59, 2  ;;  %v714_v5 = vadd.f32 %v713_v61, %v712_v56  ;;  %v706_v10 = vadd.f32 %v705_v63, %v704_v58  ;;  %v697_v34 = vrot.slane %v696_v4, 1 }
 0x360   :  { %v724_v11 = vadd.f32 %v723_v0, %v722_v59  ;;  %v715_v35 = vrot.slane %v714_v5, 1  ;;  %v707_v14 = vrot.slane %v706_v10, 1  ;;  %v698_v20 = vadd.f32 %v697_v34, %v696_v4 }
 0x362   :  { %v725_v15 = vrot.slane %v724_v11, 1  ;;  %v716_v21 = vadd.f32 %v715_v35, %v714_v5  ;;  %v708_v26 = vadd.f32 %v707_v14, %v706_v10  ;;  %v33_v5 = vld [vmem:[#allocation2 + $0x3] sm:$0x1] }
 0x364   :  { %v726_v27 = vadd.f32 %v725_v15, %v724_v11  ;;  %v717_v46 = vadd.f32 %v716_v21, %v698_v20 }
 0x366   :  { %v727_v49 = vadd.f32 %v726_v27, %v708_v26 }
 0x370   :  { %v1392_v62 = vpop.f32.mrf.mxu0 }
 0x371   :  { %v736_v7 = vmul.f32 %v1392_v62, %v1392_v62 }
 0x372   :  { %v1394_v1 = vpop.f32.mrf.mxu0 }
 0x373   :  { %v754_v12 = vmul.f32 %v1394_v1, %v1394_v1 }
 0x374   :  { %v1396_v6 = vpop.f32.mrf.mxu0 }
 0x375   :  { %v728_v8 = vadd.f32 %v1396_v6, %v1392_v62  ;;  %v737_v9 = vmul.f32 %v1396_v6, %v1396_v6 }
 0x376   :  { %v1406_v13 = vpop.f32.mrf.mxu0 }
 0x377   :  { %v729_v30 = vrot.slane %v728_v8, 4  ;;  %v738_v31 = vadd.f32 %v737_v9, %v736_v7  ;;  %v746_v32 = vadd.f32 %v1406_v13, %v1394_v1  ;;  %v755_v33 = vmul.f32 %v1406_v13, %v1406_v13  ;;  %v34_v9 = vld [vmem:[#allocation2 + $0x4] sm:$0x1] }
 0x379   :  { %v730_v36 = vadd.f32 %v729_v30, %v728_v8  ;;  %v739_v37 = vrot.slane %v738_v31, 4  ;;  %v747_v38 = vrot.slane %v746_v32, 4  ;;  %v756_v39 = vadd.f32 %v755_v33, %v754_v12 }
 0x37b   :  { %v731_v16 = vrot.slane %v730_v36, 2  ;;  %v740_v17 = vadd.f32 %v739_v37, %v738_v31  ;;  %v748_v18 = vadd.f32 %v747_v38, %v746_v32  ;;  %v757_v19 = vrot.slane %v756_v39, 4 }
 0x37d   :  { %v732_v22 = vadd.f32 %v731_v16, %v730_v36  ;;  %v741_v23 = vrot.slane %v740_v17, 2  ;;  %v749_v24 = vrot.slane %v748_v18, 2  ;;  %v758_v25 = vadd.f32 %v757_v19, %v756_v39 }
 0x37f   :  { %v733_v28 = vrot.slane %v732_v22, 1  ;;  %v742_v29 = vadd.f32 %v741_v23, %v740_v17  ;;  %v750_v40 = vadd.f32 %v749_v24, %v748_v18  ;;  %v759_v45 = vrot.slane %v758_v25, 2 }
 0x381   :  { %v734_v2 = vadd.f32 %v733_v28, %v732_v22  ;;  %v743_v3 = vrot.slane %v742_v29, 1  ;;  %v751_v47 = vrot.slane %v750_v40, 1  ;;  %v760_v48 = vadd.f32 %v759_v45, %v758_v25 }
 0x383   :  { %v735_v50 = vadd.f32 %v734_v2, %v717_v46  ;;  %v744_v51 = vadd.f32 %v743_v3, %v742_v29  ;;  %v752_v52 = vadd.f32 %v751_v47, %v750_v40  ;;  %v761_v53 = vrot.slane %v760_v48, 1 }
 0x385   :  { %v745_v54 = vadd.f32 %v744_v51, %v727_v49  ;;  %v753_v55 = vadd.f32 %v752_v52, %v735_v50  ;;  %v762_v56 = vadd.f32 %v761_v53, %v760_v48 }
 0x387   :  { %v763_v58 = vadd.f32 %v762_v56, %v745_v54  ;;  %v764_v59 = vmul.f32 0.015625, %v753_v55 }
 0x389   :  { %v765_v60 = vmul.f32 0.015625, %v763_v58  ;;  %v766_v61 = vmul.f32 %v764_v59, %v764_v59 }
 0x38b   :  { %v767_v63 = vsub.f32 %v765_v60, %v766_v61 }
 0x38d   :  { %v768_v0 = vmax.f32 %v767_v63, 0.0 }
 0x38f   :  { %v769_v4 = vadd.f32 1e-05, %v768_v0 }
 0x391   :  { %1104 = vrsqrt.f32 %v769_v4 }
 0x39e   :  { %v1105_v7 = vpop.eup %1104 }
 0x39f   :  { %v771_v8 = vmul.f32 %v1105_v7, %v33_v5 }
 0x3a1   :  { %v772_v10 = vmul.f32 %v771_v8, %v764_v59  ;;  %v777_v11 = vrot.slane %v771_v8, %v1278_v57 }
 0x3a3   :  { %v773_v12 = vsub.f32 %v34_v9, %v772_v10  ;;  %v778_v30 = vmul.f32 %v777_v11, %v1372_v41  ;;  %v779_v31 = vmul.f32 %v777_v11, %v1376_v43  ;;  %v796_v33 = vmul.f32 %v777_v11, %v1374_v42 }
 0x3a4   :  { %v797_v34 = vmul.f32 %v777_v11, %v1378_v44  ;;  %v810_v35 = vmul.f32 %v777_v11, %v1392_v62  ;;  %v811_v36 = vmul.f32 %v777_v11, %v1396_v6  ;;  %v824_v37 = vmul.f32 %v777_v11, %v1394_v1 }
 0x3a5   :  { %v783_v32 = vrot.slane %v773_v12, %v1278_v57  ;;  %v825_v38 = vmul.f32 %v777_v11, %v1406_v13 }
 0x3a7   :  { %v784_v39 = vadd.f32 %v783_v32, %v778_v30  ;;  %v785_v14 = vadd.f32 %v783_v32, %v779_v31  ;;  %v798_v15 = vadd.f32 %v796_v33, %v783_v32  ;;  %v799_v41 = vadd.f32 %v797_v34, %v783_v32 }
 0x3a8   :  { %v812_v16 = vadd.f32 %v810_v35, %v783_v32  ;;  %v813_v43 = vadd.f32 %v811_v36, %v783_v32  ;;  %v826_v17 = vadd.f32 %v824_v37, %v783_v32  ;;  %v827_v57 = vadd.f32 %v825_v38, %v783_v32 }
 0x3a9   :  { %v786_v18 = vmax.f32 %v784_v39, 0.0  ;;  %v787_v42 = vmax.f32 %v785_v14, 0.0  ;;  %v800_v19 = vmax.f32 %v798_v15, 0.0  ;;  %v801_v44 = vmax.f32 %v799_v41, 0.0 }
 0x3aa   :  { %v814_v20 = vmax.f32 %v812_v16, 0.0  ;;  %v815_v62 = vmax.f32 %v813_v43, 0.0  ;;  %v828_v21 = vmax.f32 %v826_v17, 0.0  ;;  %v829_v6 = vmax.f32 %v827_v57, 0.0 }
 0x3ab   :  { %v788_v22 = vadd.f32 %v787_v42, %v786_v18  ;;  %v802_v1 = vadd.f32 %v801_v44, %v800_v19 }
 0x3ac   :  { %v816_v23 = vadd.f32 %v815_v62, %v814_v20  ;;  %v830_v13 = vadd.f32 %v829_v6, %v828_v21 }
 0x3ad   :  { %v789_v24 = vrot.slane %v788_v22, 4  ;;  %v803_v25 = vrot.slane %v802_v1, 4 }
 0x3ae   :  { %v817_v26 = vrot.slane %v816_v23, 4  ;;  %v831_v27 = vrot.slane %v830_v13, 4 }
 0x3af   :  { %v790_v28 = vadd.f32 %v789_v24, %v788_v22  ;;  %v804_v29 = vadd.f32 %v803_v25, %v802_v1 }
 0x3b0   :  { %v818_v40 = vadd.f32 %v817_v26, %v816_v23  ;;  %v832_v45 = vadd.f32 %v831_v27, %v830_v13 }
 0x3b1   :  { %v791_v46 = vrot.slane %v790_v28, 2  ;;  %v805_v2 = vrot.slane %v804_v29, 2 }
 0x3b2   :  { %v819_v3 = vrot.slane %v818_v40, 2  ;;  %v833_v47 = vrot.slane %v832_v45, 2 }
 0x3b3   :  { %v792_v48 = vadd.f32 %v791_v46, %v790_v28  ;;  %v806_v49 = vadd.f32 %v805_v2, %v804_v29 }
 0x3b4   :  { %v820_v50 = vadd.f32 %v819_v3, %v818_v40  ;;  %v834_v51 = vadd.f32 %v833_v47, %v832_v45 }
 0x3b5   :  { %v793_v52 = vrot.slane %v792_v48, 1  ;;  %v807_v53 = vrot.slane %v806_v49, 1 }
 0x3b6   :  { %v821_v54 = vrot.slane %v820_v50, 1  ;;  %v835_v55 = vrot.slane %v834_v51, 1 }
 0x3b7   :  { %v794_v56 = vadd.f32 %v793_v52, %v792_v48  ;;  %v808_v58 = vadd.f32 %v807_v53, %v806_v49 }
 0x3b8   :  { %v822_v59 = vadd.f32 %v821_v54, %v820_v50  ;;  %v836_v60 = vadd.f32 %v835_v55, %v834_v51 }
 0x3b9   :  { %v795_v61 = vmul.f32 0.0625, %v794_v56  ;;  %v809_v63 = vmul.f32 0.0625, %v808_v58 }
 0x3ba   :  { %v823_v0 = vmul.f32 0.0625, %v822_v59  ;;  %v837_v4 = vmul.f32 0.0625, %v836_v60 }
 0x3bb   :  { %v839_v5 = vsel %vm838_vm1, %v795_v61, %v809_v63 }
 0x3bc   :  { %v841_v7 = vsel %vm840_vm2, %v839_v5, %v823_v0 }
 0x3bd   :  { %v843_v8 = vsel %vm842_vm3, %v841_v7, %v837_v4 }
 0x3be   :  { %v845_v9 = vsel %vm844_vm4, %v843_v8, 0.0 }
 0x3bf   :  { %846 = vst [vmem:[%s1428_s3] sm:$0xff] %v845_v9 }
 0x3c0   :  { %851 = vsyncpa [#allocation3], 1 }

</bundles_post_ra>
